<compile_context>
chip_gen: v7x
topology: tpu7x:2x2x1
jax: 0.10.0
libtpu: 0.0.40
codegen_flags: <defaults>
</compile_context>

<pallas_src>
from functools import partial

import jax
import jax.numpy as jnp
from jax.experimental import pallas as pl
from jax.experimental.pallas import tpu as pltpu


def _round_up(x, m):
    return (x + m - 1) // m * m


def _cdiv(a, b):
    return -(-a // b)


def _choose_tiling(B, tm_max):
    """Pick (tm, Bp, n_tiles).

    tm is a multiple of 8 (sublane aligned). When B allows, use >= 2 (and an
    even number of) grid steps so the "parallel" batch axis can be split
    across v7x's two TensorCores (no-op on single-TC v5e/v6e).
    """
    tm_cap = max(8, min(_round_up(tm_max, 8), _round_up(B, 8)))
    n = _cdiv(B, tm_cap)
    if B > 8:  # cannot split below one 8-row sublane tile
        if n < 2:
            n = 2
        if n % 2:
            n += 1
    tm = _round_up(_cdiv(B, n), 8)
    n = _cdiv(B, tm)
    return tm, tm * n, n


def mlp_kernel(x_ref, w1_ref, b1_ref, w2_ref, b2_ref, o_ref):
    # In-kernel cast of the activation tile to the matmul dtype (a no-op in
    # the f32 exact-parity mode); MXU accumulates in f32 either way.
    x = x_ref[...].astype(w1_ref.dtype)
    h = jnp.dot(x, w1_ref[...], preferred_element_type=jnp.float32)
    # Bias + ReLU in f32 (v5e VPU has no bf16 elementwise path).
    h = jnp.maximum(h + b1_ref[...], 0.0)
    out = jnp.dot(h.astype(w2_ref.dtype), w2_ref[...],
                  preferred_element_type=jnp.float32)
    # Unpadded (tm, C) store: fewer HBM bytes than a 128-lane-padded store and
    # no post-call feature slice; logits stay f32 (module semantics).
    o_ref[...] = (out + b2_ref[...]).astype(o_ref.dtype)


def prepare_params(w1, b1, w2, b2, *, compute_dtype=jnp.float32):
    """One-time weight packing (hoisted out of the per-call path).

    Pads only the hidden dim to a 128-lane multiple (zero rows/cols + zero
    bias, so ReLU(0)=0 contributes nothing) and casts the matmul weights to
    `compute_dtype`. Biases stay f32.
    """
    D, H = w1.shape
    C = w2.shape[1]
    Hp = _round_up(H, 128)
    w1p = jnp.pad(jnp.asarray(w1, compute_dtype), ((0, 0), (0, Hp - H)))
    b1p = jnp.pad(jnp.asarray(b1, jnp.float32).reshape(1, -1),
                  ((0, 0), (0, Hp - H)))
    w2p = jnp.pad(jnp.asarray(w2, compute_dtype), ((0, Hp - H), (0, 0)))
    b2p = jnp.asarray(b2, jnp.float32).reshape(1, -1)
    return w1p, b1p, w2p, b2p


@partial(jax.jit, static_argnames=("tm",))
def mlp_forward(x, w1p, b1p, w2p, b2p, *, tm=1024):
    """x: (B, D) f32; packed params from prepare_params(). Returns (B, C) f32,
    i.e. relu(x @ w1 + b1) @ w2 + b2."""
    B, D = x.shape
    Hp = w1p.shape[1]
    C = w2p.shape[1]

    tm, Bp, n_tiles = _choose_tiling(B, tm)
    xp = jnp.pad(x, ((0, Bp - B), (0, 0))) if Bp != B else x

    flops = 2 * Bp * (D * Hp + Hp * C)
    bytes_accessed = (xp.size * xp.dtype.itemsize
                      + w1p.size * w1p.dtype.itemsize
                      + w2p.size * w2p.dtype.itemsize
                      + b1p.size * 4 + b2p.size * 4
                      + Bp * C * 4)

    out = pl.pallas_call(
        mlp_kernel,
        out_shape=jax.ShapeDtypeStruct((Bp, C), jnp.float32),
        grid_spec=pltpu.PrefetchScalarGridSpec(
            num_scalar_prefetch=0,
            grid=(n_tiles,),
            in_specs=[
                # Activation tile: advances with the batch grid index.
                # Last dim D equals the full array dim -> legal block shape,
                # no feature padding needed.
                pl.BlockSpec((tm, D), lambda i: (i, 0)),
                # Weights / biases: same block for every i -> stay resident in
                # VMEM (Pallas only re-DMAs the activation/output tiles).
                # NOTE: if this MLP is reused with H/D in the thousands, add
                # pipeline_mode=pl.Buffered(1) here and set vmem_limit_bytes
                # (v7x has only 64 MiB physical VMEM); irrelevant at H=50.
                pl.BlockSpec((D, Hp), lambda i: (0, 0)),
                pl.BlockSpec((1, Hp), lambda i: (0, 0)),
                pl.BlockSpec((Hp, C), lambda i: (0, 0)),
                pl.BlockSpec((1, C), lambda i: (0, 0)),
            ],
            out_specs=pl.BlockSpec((tm, C), lambda i: (i, 0)),
        ),
        compiler_params=pltpu.CompilerParams(
            # Batch tiles are independent -> shard over v7x's 2 TensorCores.
            dimension_semantics=("parallel",),
        ),
        cost_estimate=pl.CostEstimate(
            flops=flops, transcendentals=0, bytes_accessed=bytes_accessed),
    )(xp, w1p, b1p, w2p, b2p)

    return out[:B] if Bp != B else out


def init_params(key, input_dim, hidden_dim, num_classes):
    """Deterministic init matching nn.Linear shapes (stored as (in, out))."""
    k1, k2, k3, k4 = jax.random.split(key, 4)
    # torch default: U(-1/sqrt(fan_in), 1/sqrt(fan_in))
    bound1 = 1.0 / jnp.sqrt(input_dim)
    bound2 = 1.0 / jnp.sqrt(hidden_dim)
    w1 = jax.random.uniform(k1, (input_dim, hidden_dim), jnp.float32, -bound1, bound1)
    b1 = jax.random.uniform(k2, (1, hidden_dim), jnp.float32, -bound1, bound1)
    w2 = jax.random.uniform(k3, (hidden_dim, num_classes), jnp.float32, -bound2, bound2)
    b2 = jax.random.uniform(k4, (1, num_classes), jnp.float32, -bound2, bound2)
    return w1, b1, w2, b2


if __name__ == "__main__":
    B, D, H, C = 8, 32, 50, 10   # batch, input_dim, hidden (fixed 50), classes

    key = jax.random.PRNGKey(0)
    kx, kp, kx2 = jax.random.split(key, 3)
    x = jax.random.normal(kx, (B, D), jnp.float32)
    w1, b1, w2, b2 = init_params(kp, D, H, C)

    # --- Exact-parity (f32) path: matches the f32 PyTorch forward. ---
    params_f32 = prepare_params(w1, b1, w2, b2, compute_dtype=jnp.float32)
    out = mlp_forward(x, *params_f32)
    jax.block_until_ready(out)
    assert out.shape == (B, C)
    ref_f32 = (jnp.maximum(
        jnp.dot(x, w1, precision=jax.lax.Precision.HIGHEST) + b1, 0.0))
    ref_f32 = jnp.dot(ref_f32, w2, precision=jax.lax.Precision.HIGHEST) + b2
    assert jnp.allclose(out, ref_f32, atol=1e-2, rtol=1e-3)

    # Multi-tile / padded-batch path (exercises tiling, batch pad and the
    # even-grid logic used for v7x's 2 TensorCores).
    x_big = jax.random.normal(kx2, (300, D), jnp.float32)
    out_big = mlp_forward(x_big, *params_f32)
    jax.block_until_ready(out_big)
    assert out_big.shape == (300, C)
    ref_big = (jnp.maximum(
        jnp.dot(x_big, w1, precision=jax.lax.Precision.HIGHEST) + b1, 0.0))
    ref_big = jnp.dot(ref_big, w2, precision=jax.lax.Precision.HIGHEST) + b2
    assert jnp.allclose(out_big, ref_big, atol=1e-2, rtol=1e-3)

    # --- bf16 MXU mode (optional perf path; f32 accumulation). ---
    params_bf16 = prepare_params(w1, b1, w2, b2, compute_dtype=jnp.bfloat16)
    out_bf = mlp_forward(x, *params_bf16)
    jax.block_until_ready(out_bf)
    h_ref = jnp.maximum(
        jnp.dot(x.astype(jnp.bfloat16), w1.astype(jnp.bfloat16),
                preferred_element_type=jnp.float32) + b1, 0.0)
    ref_bf = jnp.dot(h_ref.astype(jnp.bfloat16), w2.astype(jnp.bfloat16),
                     preferred_element_type=jnp.float32) + b2
    assert jnp.allclose(out_bf, ref_bf, atol=1e-3, rtol=1e-3)

    print("KERNEL_OK")
</pallas_src>

<mosaic_0001>
module attributes {stable_mosaic.version = 11 : i64} {
  func.func @mlp_kernel(%arg0: i32, %arg1: memref<8x32xf32, #tpu.memory_space<vmem>>, %arg2: memref<32x128xf32, #tpu.memory_space<vmem>>, %arg3: memref<1x128xf32, #tpu.memory_space<vmem>>, %arg4: memref<128x10xf32, #tpu.memory_space<vmem>>, %arg5: memref<1x10xf32, #tpu.memory_space<vmem>>, %arg6: memref<8x10xf32, #tpu.memory_space<vmem>>) attributes {dimension_semantics = [#tpu.dimension_semantics<parallel>], iteration_bounds = array<i64: 1>, scalar_prefetch = 0 : i64, scratch_operands = 0 : i64, tpu.core_type = #tpu.core_type<tc>, window_params = [{transform_indices = @transform_0, window_bounds = array<i64: 8, 32>}, {pipeline_mode = #tpu.pipeline_mode<synchronous>, transform_indices = @transform_1, window_bounds = array<i64: 32, 128>}, {pipeline_mode = #tpu.pipeline_mode<synchronous>, transform_indices = @transform_2, window_bounds = array<i64: 1, 128>}, {pipeline_mode = #tpu.pipeline_mode<synchronous>, transform_indices = @transform_3, window_bounds = array<i64: 128, 10>}, {pipeline_mode = #tpu.pipeline_mode<synchronous>, transform_indices = @transform_4, window_bounds = array<i64: 1, 10>}, {transform_indices = @transform_5, window_bounds = array<i64: 8, 10>}]} {
    %c0 = arith.constant 0 : index
    %c0_0 = arith.constant 0 : index
    %0 = vector.load %arg1[%c0, %c0_0] : memref<8x32xf32, #tpu.memory_space<vmem>>, vector<8x32xf32>
    %c0_1 = arith.constant 0 : index
    %c0_2 = arith.constant 0 : index
    %1 = vector.load %arg2[%c0_1, %c0_2] : memref<32x128xf32, #tpu.memory_space<vmem>>, vector<32x128xf32>
    %cst = arith.constant dense<0.000000e+00> : vector<8x128xf32>
    %2 = tpu.matmul %0, %1, %cst {dimension_numbers = #tpu.dot_dimension_numbers<[1], [0], [0], [1], [0, 0, 1, 1], [], []>} : vector<8x32xf32>, vector<32x128xf32>, vector<8x128xf32> -> vector<8x128xf32>
    %c0_3 = arith.constant 0 : index
    %c0_4 = arith.constant 0 : index
    %3 = vector.load %arg3[%c0_3, %c0_4] : memref<1x128xf32, #tpu.memory_space<vmem>>, vector<1x128xf32>
    %4 = vector.broadcast %3 : vector<1x128xf32> to vector<8x128xf32>
    %5 = arith.addf %2, %4 : vector<8x128xf32>
    %cst_5 = arith.constant 0.000000e+00 : f32
    %6 = vector.broadcast %cst_5 : f32 to vector<8x128xf32>
    %7 = arith.maximumf %5, %6 : vector<8x128xf32>
    %c0_6 = arith.constant 0 : index
    %c0_7 = arith.constant 0 : index
    %8 = vector.load %arg4[%c0_6, %c0_7] : memref<128x10xf32, #tpu.memory_space<vmem>>, vector<128x10xf32>
    %cst_8 = arith.constant dense<0.000000e+00> : vector<8x10xf32>
    %9 = tpu.matmul %7, %8, %cst_8 {dimension_numbers = #tpu.dot_dimension_numbers<[1], [0], [0], [1], [0, 0, 1, 1], [], []>} : vector<8x128xf32>, vector<128x10xf32>, vector<8x10xf32> -> vector<8x10xf32>
    %c0_9 = arith.constant 0 : index
    %c0_10 = arith.constant 0 : index
    %10 = vector.load %arg5[%c0_9, %c0_10] : memref<1x10xf32, #tpu.memory_space<vmem>>, vector<1x10xf32>
    %11 = vector.broadcast %10 : vector<1x10xf32> to vector<8x10xf32>
    %12 = arith.addf %9, %11 : vector<8x10xf32>
    %c0_11 = arith.constant 0 : index
    %c0_12 = arith.constant 0 : index
    %13 = vector.load %arg6[%c0_11, %c0_12] : memref<8x10xf32, #tpu.memory_space<vmem>>, vector<8x10xf32>
    tpu.vector_store %arg6[%c0_11, %c0_12], %12 {strides = array<i32>} : memref<8x10xf32, #tpu.memory_space<vmem>>, vector<8x10xf32>,
    return
  }
  func.func @transform_0(%arg0: i32) -> (i32, i32) {
    %c0_i32 = arith.constant 0 : i32
    %c0_i32_0 = arith.constant 0 : i32
    return %arg0, %c0_i32 : i32, i32
  }
  func.func @transform_1(%arg0: i32) -> (i32, i32) {
    %c0_i32 = arith.constant 0 : i32
    %c0_i32_0 = arith.constant 0 : i32
    %c0_i32_1 = arith.constant 0 : i32
    return %c0_i32, %c0_i32_0 : i32, i32
  }
  func.func @transform_2(%arg0: i32) -> (i32, i32) {
    %c0_i32 = arith.constant 0 : i32
    %c0_i32_0 = arith.constant 0 : i32
    %c0_i32_1 = arith.constant 0 : i32
    return %c0_i32, %c0_i32_0 : i32, i32
  }
  func.func @transform_3(%arg0: i32) -> (i32, i32) {
    %c0_i32 = arith.constant 0 : i32
    %c0_i32_0 = arith.constant 0 : i32
    %c0_i32_1 = arith.constant 0 : i32
    return %c0_i32, %c0_i32_0 : i32, i32
  }
  func.func @transform_4(%arg0: i32) -> (i32, i32) {
    %c0_i32 = arith.constant 0 : i32
    %c0_i32_0 = arith.constant 0 : i32
    %c0_i32_1 = arith.constant 0 : i32
    return %c0_i32, %c0_i32_0 : i32, i32
  }
  func.func @transform_5(%arg0: i32) -> (i32, i32) {
    %c0_i32 = arith.constant 0 : i32
    %c0_i32_0 = arith.constant 0 : i32
    return %arg0, %c0_i32 : i32, i32
  }
}

</mosaic_0001>

<bundles_post_ra>
// kernel: mlp_forward.1
= control target key start
LH: loop header
LB: loop body
LE: loop exit
PB: predicated region body
PF: predicated region fallthrough
CT: control target
= control target key end

     0   :  { %v346_v3 = vmov 0.0|0.0   ;;  %vm347_vm0 = vmmov 0   ;;  %v348_v6 = vmov 0.0   ;;  %s461_s0 = inlined_call_operand.vmem [shape: f32[8,32], index: 0, kind: input, shape index: {}]   ;;  %s462_s1 = inlined_call_operand.vmem [shape: f32[32,128], index: 1, kind: input, shape index: {}]   ;;  %s463_s2 = inlined_call_operand.vmem [shape: f32[1,128], index: 2, kind: input, shape index: {}]   ;;  %s464_s3 = inlined_call_operand.vmem [shape: f32[128,10], index: 3, kind: input, shape index: {}]   ;;  %s465_s4 = inlined_call_operand.vmem [shape: f32[1,10], index: 4, kind: input, shape index: {}]   ;;  %s466_s5 = inlined_call_operand.hbm [shape: f32[8,10], index: 5, kind: output, shape index: {}]  }
   0x1   :  { %v22_v0 = vld [vmem:[%s462_s1] sm:$0xff]  ;;  %v23_v1 = vld [vmem:[%s462_s1 + $0x8] sm:$0xff]  ;;  %v24_v2 = vld [vmem:[%s462_s1 + $0x10] sm:$0xff]  ;;  %288 = vmatprep.subr.bf16.mxu0 %v346_v3  ;;  %250 = vmatprep.mubr.msk.f32.mxu0 %vm347_vm0, %v348_v6 }
   0x2   :  { %v289_v4 = vpack.c.bf16 %v23_v1, %v22_v0  ;;  %v25_v5 = vld [vmem:[%s462_s1 + $0x18] sm:$0xff]  ;;  %v108_v7 = vld [vmem:[%s464_s3] sm:$0xff]  ;;  %294 = vmatprep.subr.bf16.mxu1 %v346_v3  ;;  %v109_v8 = vld [vmem:[%s464_s3 + $0x8] sm:$0xff]  ;;  %285 = vmatprep.mubr.msk.f32.mxu1 %vm347_vm0, %v348_v6 }
   0x3   :  { %v110_v9 = vld [vmem:[%s464_s3 + $0x10] sm:$0xff]  ;;  %v111_v10 = vld [vmem:[%s464_s3 + $0x18] sm:$0xff]  ;;  %v292_v11 = vpack.c.bf16 %v25_v5, %v24_v2  ;;  %v295_v12 = vpack.c.bf16 %v109_v8, %v108_v7  ;;  %v112_v14 = vld [vmem:[%s464_s3 + $0x20] sm:$0xff] }
   0x4   :  { %290 = vmatpush3.bf16.msra.mxu0 %v289_v4  ;;  %v298_v13 = vpack.c.bf16 %v111_v10, %v110_v9  ;;  %v113_v15 = vld [vmem:[%s464_s3 + $0x28] sm:$0xff] }
   0x5   :  { %291 = vmatprep.subr.bf16.mxu0 %v346_v3  ;;  %296 = vmatpush3.bf16.msra.mxu1 %v295_v12 }
   0x6   :  { %297 = vmatprep.subr.bf16.mxu1 %v346_v3 }
   0x7   :  { %10 = vsyncpa [#allocation3], 0  ;;  %v21_v16 = vld [vmem:[%s461_s0] sm:$0xff]  ;;  %vm33_vm1 = vcmask 261120   ;;  %v301_v17 = vpack.c.bf16 %v113_v15, %v112_v14  ;;  %v114_v18 = vld [vmem:[%s464_s3 + $0x30] sm:$0xff]  ;;  %s349_s11 = smov [#allocation2]  }
   0x8   :  { %293 = vmatpush3.bf16.msra.mxu0 %v292_v11  ;;  %v115_v19 = vld [vmem:[%s464_s3 + $0x38] sm:$0xff]  ;;  %v116_v21 = vld [vmem:[%s464_s3 + $0x40] sm:$0xff]  ;;  %v117_v22 = vld [vmem:[%s464_s3 + $0x48] sm:$0xff]  ;;  %s209_s12 = sshll.u32 %s349_s11, 4  ;;  %vm201_vm2 = vcmask 80896   ;;  %s210_s12 = int_to_ptr.vmem [resolvable:$true] %s209_s12 }
   0x9   :  { %299 = vmatpush3.bf16.msra.mxu1 %v298_v13  ;;  %v304_v20 = vpack.c.bf16 %v115_v19, %v114_v18  ;;  %v307_v23 = vpack.c.bf16 %v117_v22, %v116_v21  ;;  %v118_v24 = vld [vmem:[%s464_s3 + $0x50] sm:$0xff]  ;;  %v119_v25 = vld [vmem:[%s464_s3 + $0x58] sm:$0xff]  ;;  %v120_v27 = vld [vmem:[%s464_s3 + $0x60] sm:$0xff]  ;;  %p327_p1 = scmp.lt.s32.totalorder %s210_s12, %s210_s12 }
   0xa   :  { %300 = vmatprep.subr.bf16.mxu1 %v346_v3  ;;  %v310_v26 = vpack.c.bf16 %v119_v25, %v118_v24  ;;  %v121_v28 = vld [vmem:[%s464_s3 + $0x68] sm:$0xff]  ;;  %v122_v30 = vld [vmem:[%s464_s3 + $0x70] sm:$0xff]  ;;  %v123_v31 = vld [vmem:[%s464_s3 + $0x78] sm:$0xff]  ;;  %s322_s3 = scalar_lea.vmem %s210_s12, 128 }
   0xb   :  { %251 = vmatmul.mubr.msk.f32.vlgmr.msra.gmra.mrb[0].mxu0 %vm33_vm1, %v21_v16  ;;  %v313_v29 = vpack.c.bf16 %v121_v28, %v120_v27  ;;  %v316_v32 = vpack.c.bf16 %v123_v31, %v122_v30  ;;  %v217_v33 = vld [vmem:[%s463_s2] ss:$0 sm:$0xff]  ;;  %p323_p0 = scmp.ne.s32.totalorder %s210_s12, %s322_s3  ;;  %p328_p2 = scmp.lt.s32.totalorder %s322_s3, %s322_s3 }
   0xc   :  { %v219_v38 = vld [vmem:[%s465_s4] ss:$0 sm:$0xff] }
   0xd   :  { %302 = vmatpush3.bf16.msra.mxu1 %v301_v17  ;;  %p329_p3 = por %p328_p2, %p327_p1 }
   0xe   :  { %303 = vmatprep.subr.bf16.mxu1 %v346_v3 }
   0xf   :  { %p330_p4 = pnand %p329_p3, %p323_p0 }
  0x11   :  { %305 = vmatpush3.bf16.msra.mxu1 %v304_v20 }
  0x12   :  { %306 = vmatprep.subr.bf16.mxu1 %v346_v3 }
  0x15   :  { %308 = vmatpush3.bf16.msra.mxu1 %v307_v23 }
  0x16   :  { %309 = vmatprep.subr.bf16.mxu1 %v346_v3 }
  0x19   :  { %311 = vmatpush3.bf16.msra.mxu1 %v310_v26 }
  0x1a   :  { %312 = vmatprep.subr.bf16.mxu1 %v346_v3 }
  0x1d   :  { %314 = vmatpush3.bf16.msra.mxu1 %v313_v29 }
  0x1e   :  { %315 = vmatprep.subr.bf16.mxu1 %v346_v3 }
  0x21   :  { %317 = vmatpush3.bf16.msra.mxu1 %v316_v32 }
  0xde   :  { %v103_v34 = vpop.f32.mrb[0].mxu0 }
  0xdf   :  { %v104_v35 = vadd.f32 %v217_v33, %v103_v34  ;;  %v252_v36 = vpop.f32.mrb[1].mxu0 }
  0xe1   :  { %v107_v37 = vmax.f32 %v104_v35, 0.0 }
  0xe3   :  { %286 = vmatmul.mubr.f32.vlgmr.msra.gmra.mrb[0].mxu1 %v107_v37 }
 0x1b6   :  { %v197_v39 = vpop.f32.mrb[0].mxu1 }
 0x1b7   :  { %v198_v40 = vadd.f32 %v219_v38, %v197_v39  ;;  %v287_v41 = vpop.f32.mrb[1].mxu1 }
 0x1b9   :  { %202 = vst.msk [vmem:[#allocation2] sm:$0xff] %vm201_vm2, %v198_v40 }
 0x1ba   :  { %333 = shalt.err (!%p330_p4)
}
 0x1bb   :  { %s334_s14 = scalar_lea.hbm %s466_s5, 128 }
 0x1bc   :  { %p335_p5 = scmp.ne.s32.totalorder %s466_s5, %s334_s14  ;;  %p338_p6 = scmp.lt.u32.totalorder %s334_s14, %s466_s5 }
 0x1be   :  { %p340_p7 = pnand %p338_p6, %p335_p5 }
 0x1c0   :  { %343 = shalt.err (!%p340_p7)
}
 0x1c1   :  { %212 = dma.vmem_to_hbm [thread:$0]  %s210_s12, 128, %s466_s5, [#allocation3]  }
 0x1c2   :  { %344 = dma.done.wait [#allocation3], 128  }
 0x1c3   :  { %345 = vsyncadd [#allocation3], 4294967168 }
 0x1c4   :  { %216 = vsyncpa [#allocation3], 1 }

</bundles_post_ra>
